<compile_context>
chip_gen: v7x
topology: tpu7x:2x2x1
jax: 0.10.0
libtpu: 0.0.40
codegen_flags: <defaults>
</compile_context>

<pallas_src>
import functools

import jax
import jax.numpy as jnp
from jax.experimental import pallas as pl
from jax.experimental.pallas import tpu as pltpu


def _motion_align_kernel(geo_ref, feat_ref, wg_ref, wf_ref, b_ref, out_ref, *, tn, k):
    """One (batch, N-tile) block.

    geo_ref  : [1, TN, K, 4]   relative nn vectors + distance
    feat_ref : [1, TN, K, C]   gathered motion features (reused for weighted sum)
    wg_ref   : [4,  Ch2]       fused-conv weight, geometric channels
    wf_ref   : [C,  Ch2]       fused-conv weight, feature channels
    b_ref    : [1,  Ch2]       fused bias
    out_ref  : [1, C, TN]      lane-dense output (channels on sublanes, points on lanes)
    """
    c = feat_ref.shape[-1]
    ch2 = wg_ref.shape[-1]

    geo = geo_ref[0].reshape(tn * k, 4).astype(jnp.float32)       # leading-dim merge (free for K==8)
    feat = feat_ref[0]                                            # [TN, K, C]
    feat_flat = feat.reshape(tn * k, c).astype(jnp.float32)       # [TN*K, C]

    # Fused (activation-free) 1x1-conv MLP; the torch concat([geo, feat]) is
    # realized as two matmuls so feat2 is only read from HBM once.
    h = (jnp.dot(geo, wg_ref[...], preferred_element_type=jnp.float32)
         + jnp.dot(feat_flat, wf_ref[...], preferred_element_type=jnp.float32)
         + b_ref[...].astype(jnp.float32))                        # [TN*K, Ch2]

    # Channel max (torch.max over the channel dim) — reduce over the lane dim.
    logit = jnp.max(h.reshape(tn, k, ch2), axis=-1)               # [TN, K]

    # Softmax over the K neighbors; the divide rides the EUP via approx reciprocal.
    m = jnp.max(logit, axis=-1, keepdims=True)
    e = jnp.exp(logit - m)
    wts = e * pl.reciprocal(jnp.sum(e, axis=-1, keepdims=True), approx=True)  # [TN, K]

    # Weighted reduction over K, then transpose so points land on lanes (dense vst).
    out = jnp.sum(feat.astype(jnp.float32) * wts[:, :, None], axis=1)   # [TN, C]
    out_ref[0] = out.T.astype(out_ref.dtype)                            # [C, TN]


def _knn_gather_glue(points1, points2, motion1, k):
    """Brute-force KNN + gathers (data-dependent, stays in XLA).

    anchors = points2 (M points), neighbor pool = points1 (N points); matches
    knn_group(points2, points1, k) in the PyTorch forward (motion1 is indexed
    by points1 indices).
    Returns nn_group [B,M,k,4] and feat2 [B,M,k,C].
    """
    p_pool = jnp.transpose(points1, (0, 2, 1))    # [B, N, 3]
    p_anchor = jnp.transpose(points2, (0, 2, 1))  # [B, M, 3]
    m1 = jnp.transpose(motion1, (0, 2, 1))        # [B, N, C]

    d2 = (jnp.sum(p_anchor * p_anchor, -1, keepdims=True)
          + jnp.sum(p_pool * p_pool, -1)[:, None, :]
          - 2.0 * jnp.einsum("bmd,bnd->bmn", p_anchor, p_pool))   # [B, M, N]
    _, nn_idx = jax.lax.top_k(-d2, k)                             # [B, M, k]

    gather = jax.vmap(lambda arr, idx: arr[idx])                  # [N,D],[M,k] -> [M,k,D]
    nn_pts = gather(p_pool, nn_idx)                               # [B, M, k, 3]
    feat2 = gather(m1, nn_idx)                                    # [B, M, k, C]

    rela = nn_pts - p_anchor[:, :, None, :]                       # [B, M, k, 3]
    dist = jnp.sqrt(jnp.sum(rela * rela, axis=-1, keepdims=True)) # [B, M, k, 1]
    nn_group = jnp.concatenate([rela, dist], axis=-1)             # [B, M, k, 4]
    return nn_group, feat2


def _choose_n_tile(m, c, k, itemsize, target=1024, vmem_budget=24 << 20):
    """Largest lane-aligned N-tile that divides M, bounded by a per-step VMEM budget.

    The minor dims of the two input blocks ([K,4] and [K,C]) pad up to 128
    lanes in VMEM, so the budget math uses the padded widths.  Falls back to a
    single block per batch (tn == M) when no 128-multiple divides M, which is
    always layout-legal (full-dim block)."""
    def lane_pad(d):
        return max(128, ((d + 127) // 128) * 128)

    # 2x = double-buffered pipeline stages for each input block.
    per_point = 2 * k * (lane_pad(4) + lane_pad(c)) * itemsize + 8 * c
    cap = min(target, max(128, (vmem_budget // max(per_point, 1)) // 128 * 128))
    if m <= cap:
        return m
    for t in range(cap, 127, -128):
        if m % t == 0:
            return t
    return m


def motion_align(points1, points2, motion1, params, k):
    """points1: [B,3,N]; points2: [B,3,M]; motion1: [B,C,N] -> aligned_motion [B,C,M]."""
    w1, b1, w2, b2 = params
    B = points1.shape[0]
    M = points2.shape[2]
    C = motion1.shape[1]
    Cin, Ch1 = w1.shape
    Ch2 = w2.shape[1]
    assert Cin == C + 4

    # Fuse the two activation-free 1x1 convs (valid: the Sequential has no BN/ReLU),
    # and split the fused weight into geometric (first 4) / feature (last C) rows.
    w_fused = (w1.astype(jnp.float32) @ w2.astype(jnp.float32))              # [C+4, Ch2]
    b_fused = (b1.astype(jnp.float32) @ w2.astype(jnp.float32)
               + b2.astype(jnp.float32))                                     # [1, Ch2]
    w_geo = w_fused[:4]                                                      # [4, Ch2]
    w_feat = w_fused[4:]                                                     # [C, Ch2]

    nn_group, feat2 = _knn_gather_glue(points1, points2, motion1, k)
    # Keep kernel inputs in the model dtype (bf16 models halve HBM traffic for free;
    # the kernel upcasts to f32 internally for compute/accumulation).
    nn_group = nn_group.astype(motion1.dtype)
    feat2 = feat2.astype(motion1.dtype)

    itemsize = jnp.dtype(motion1.dtype).itemsize
    tn = _choose_n_tile(M, C, k, itemsize)
    grid = (B, M // tn)

    grid_spec = pltpu.PrefetchScalarGridSpec(
        num_scalar_prefetch=0,
        grid=grid,
        in_specs=[
            pl.BlockSpec((1, tn, k, 4), lambda b, i: (b, i, 0, 0)),
            pl.BlockSpec((1, tn, k, C), lambda b, i: (b, i, 0, 0)),
            pl.BlockSpec((4, Ch2), lambda b, i: (0, 0)),
            pl.BlockSpec((C, Ch2), lambda b, i: (0, 0)),
            pl.BlockSpec((1, Ch2), lambda b, i: (0, 0)),
        ],
        out_specs=pl.BlockSpec((1, C, tn), lambda b, i: (b, 0, i)),
    )

    cost = pl.CostEstimate(
        flops=2 * B * M * k * (Cin * Ch2 + C),
        transcendentals=B * M * (k + 1),
        bytes_accessed=(nn_group.size + feat2.size + B * C * M) * itemsize,
    )

    out = pl.pallas_call(
        functools.partial(_motion_align_kernel, tn=tn, k=k),
        out_shape=jax.ShapeDtypeStruct((B, C, M), motion1.dtype),
        grid_spec=grid_spec,
        compiler_params=pltpu.CompilerParams(
            dimension_semantics=("parallel", "parallel"),
            vmem_limit_bytes=32 * 1024 * 1024,   # tiles sized well below this; safe on v5e/v6e/v7x
        ),
        cost_estimate=cost,
    )(nn_group, feat2, w_geo, w_feat, b_fused)
    return out                                                    # already [B, C, M]


def motion_align_reference(points1, points2, motion1, params, k):
    """Pure-JAX reference mirroring the PyTorch forward (unfused convs)."""
    w1, b1, w2, b2 = params
    nn_group, feat2 = _knn_gather_glue(points1, points2, motion1, k)
    x = jnp.concatenate([nn_group, feat2], axis=-1)               # [B, M, k, C+4]
    h1 = jnp.einsum("bnki,io->bnko", x, w1) + b1[0]
    h2 = jnp.einsum("bnki,io->bnko", h1, w2) + b2[0]
    logit = jnp.max(h2, axis=-1)                                  # [B, M, k]
    wts = jax.nn.softmax(logit, axis=-1)
    out = jnp.sum(feat2 * wts[..., None], axis=2)                 # [B, M, C]
    return jnp.transpose(out, (0, 2, 1))                          # [B, C, M]


if __name__ == "__main__":
    B, N, FEATURE_SIZE, K = 2, 16, 32, 8
    C = FEATURE_SIZE

    key = jax.random.PRNGKey(0)
    kp1, kp2, km, kw1, kb1, kw2, kb2 = jax.random.split(key, 7)

    points1 = jax.random.normal(kp1, (B, 3, N), jnp.float32)
    points2 = jax.random.normal(kp2, (B, 3, N), jnp.float32)
    motion1 = jax.random.normal(km, (B, C, N), jnp.float32)

    # Deterministic synthetic parameters for the two 1x1 Conv2d layers:
    #   conv1: (C+4) -> C/2, conv2: C/2 -> C/4 (stored as [Cin, Cout] matrices).
    w1 = 0.1 * jax.random.normal(kw1, (C + 4, C // 2), jnp.float32)
    b1 = 0.1 * jax.random.normal(kb1, (1, C // 2), jnp.float32)
    w2 = 0.1 * jax.random.normal(kw2, (C // 2, C // 4), jnp.float32)
    b2 = 0.1 * jax.random.normal(kb2, (1, C // 4), jnp.float32)
    params = (w1, b1, w2, b2)

    out = jax.block_until_ready(motion_align(points1, points2, motion1, params, K))
    ref = jax.block_until_ready(motion_align_reference(points1, points2, motion1, params, K))

    assert out.shape == (B, C, N), out.shape
    assert jnp.allclose(out, ref, rtol=2e-2, atol=2e-2), float(jnp.max(jnp.abs(out - ref)))
    print("KERNEL_OK")
</pallas_src>

<mosaic_0001>
module attributes {stable_mosaic.version = 11 : i64} {
  func.func @_motion_align_kernel(%arg0: i32, %arg1: i32, %arg2: memref<1x16x8x4xf32, #tpu.memory_space<vmem>>, %arg3: memref<1x16x8x32xf32, #tpu.memory_space<vmem>>, %arg4: memref<4x8xf32, #tpu.memory_space<vmem>>, %arg5: memref<32x8xf32, #tpu.memory_space<vmem>>, %arg6: memref<1x8xf32, #tpu.memory_space<vmem>>, %arg7: memref<1x32x16xf32, #tpu.memory_space<vmem>>) attributes {dimension_semantics = [#tpu.dimension_semantics<parallel>, #tpu.dimension_semantics<parallel>], iteration_bounds = array<i64: 2, 1>, scalar_prefetch = 0 : i64, scratch_operands = 0 : i64, tpu.core_type = #tpu.core_type<tc>, window_params = [{transform_indices = @transform_0, window_bounds = array<i64: 1, 16, 8, 4>}, {transform_indices = @transform_1, window_bounds = array<i64: 1, 16, 8, 32>}, {pipeline_mode = #tpu.pipeline_mode<synchronous>, transform_indices = @transform_2, window_bounds = array<i64: 4, 8>}, {pipeline_mode = #tpu.pipeline_mode<synchronous>, transform_indices = @transform_3, window_bounds = array<i64: 32, 8>}, {pipeline_mode = #tpu.pipeline_mode<synchronous>, transform_indices = @transform_4, window_bounds = array<i64: 1, 8>}, {transform_indices = @transform_5, window_bounds = array<i64: 1, 32, 16>}]} {
    %c0 = arith.constant 0 : index
    %c0_0 = arith.constant 0 : index
    %c0_1 = arith.constant 0 : index
    %c0_2 = arith.constant 0 : index
    %0 = vector.load %arg2[%c0, %c0_0, %c0_1, %c0_2] : memref<1x16x8x4xf32, #tpu.memory_space<vmem>>, vector<1x16x8x4xf32>
    %1 = vector.shape_cast %0 : vector<1x16x8x4xf32> to vector<16x8x4xf32>
    %2 = vector.shape_cast %1 : vector<16x8x4xf32> to vector<128x4xf32>
    %c0_3 = arith.constant 0 : index
    %c0_4 = arith.constant 0 : index
    %c0_5 = arith.constant 0 : index
    %c0_6 = arith.constant 0 : index
    %3 = vector.load %arg3[%c0_3, %c0_4, %c0_5, %c0_6] : memref<1x16x8x32xf32, #tpu.memory_space<vmem>>, vector<1x16x8x32xf32>
    %4 = vector.shape_cast %3 : vector<1x16x8x32xf32> to vector<16x8x32xf32>
    %5 = vector.shape_cast %4 : vector<16x8x32xf32> to vector<128x32xf32>
    %c0_7 = arith.constant 0 : index
    %c0_8 = arith.constant 0 : index
    %6 = vector.load %arg4[%c0_7, %c0_8] : memref<4x8xf32, #tpu.memory_space<vmem>>, vector<4x8xf32>
    %cst = arith.constant dense<0.000000e+00> : vector<128x8xf32>
    %7 = tpu.matmul %2, %6, %cst {dimension_numbers = #tpu.dot_dimension_numbers<[1], [0], [0], [1], [0, 0, 1, 1], [], []>} : vector<128x4xf32>, vector<4x8xf32>, vector<128x8xf32> -> vector<128x8xf32>
    %c0_9 = arith.constant 0 : index
    %c0_10 = arith.constant 0 : index
    %8 = vector.load %arg5[%c0_9, %c0_10] : memref<32x8xf32, #tpu.memory_space<vmem>>, vector<32x8xf32>
    %cst_11 = arith.constant dense<0.000000e+00> : vector<128x8xf32>
    %9 = tpu.matmul %5, %8, %cst_11 {dimension_numbers = #tpu.dot_dimension_numbers<[1], [0], [0], [1], [0, 0, 1, 1], [], []>} : vector<128x32xf32>, vector<32x8xf32>, vector<128x8xf32> -> vector<128x8xf32>
    %10 = arith.addf %7, %9 : vector<128x8xf32>
    %c0_12 = arith.constant 0 : index
    %c0_13 = arith.constant 0 : index
    %11 = vector.load %arg6[%c0_12, %c0_13] : memref<1x8xf32, #tpu.memory_space<vmem>>, vector<1x8xf32>
    %12 = vector.broadcast %11 : vector<1x8xf32> to vector<128x8xf32>
    %13 = arith.addf %10, %12 : vector<128x8xf32>
    %14 = vector.shape_cast %13 : vector<128x8xf32> to vector<16x8x8xf32>
    %cst_14 = arith.constant dense<0xFF800000> : vector<16x8xf32>
    %15 = vector.multi_reduction <maximumf>, %14, %cst_14 [2] : vector<16x8x8xf32> to vector<16x8xf32>
    %cst_15 = arith.constant dense<0xFF800000> : vector<16xf32>
    %16 = vector.multi_reduction <maximumf>, %15, %cst_15 [1] : vector<16x8xf32> to vector<16xf32>
    %17 = vector.shape_cast %16 : vector<16xf32> to vector<16x1xf32>
    %18 = vector.broadcast %17 : vector<16x1xf32> to vector<16x8xf32>
    %19 = arith.subf %15, %18 : vector<16x8xf32>
    %20 = math.exp %19 : vector<16x8xf32>
    %cst_16 = arith.constant dense<0.000000e+00> : vector<16xf32>
    %21 = vector.multi_reduction <add>, %20, %cst_16 [1] : vector<16x8xf32> to vector<16xf32>
    %22 = vector.shape_cast %21 : vector<16xf32> to vector<16x1xf32>
    %23 = tpu.reciprocal %22 {approx = true} : vector<16x1xf32> -> vector<16x1xf32>
    %24 = vector.broadcast %23 : vector<16x1xf32> to vector<16x8xf32>
    %25 = arith.mulf %20, %24 : vector<16x8xf32>
    %26 = vector.shape_cast %25 : vector<16x8xf32> to vector<16x8x1xf32>
    %27 = vector.broadcast %26 : vector<16x8x1xf32> to vector<16x8x32xf32>
    %28 = arith.mulf %4, %27 : vector<16x8x32xf32>
    %cst_17 = arith.constant dense<0.000000e+00> : vector<16x32xf32>
    %29 = vector.multi_reduction <add>, %28, %cst_17 [1] : vector<16x8x32xf32> to vector<16x32xf32>
    %30 = tpu.transpose %29, [1, 0] : vector<16x32xf32> -> vector<32x16xf32>
    %c0_18 = arith.constant 0 : index
    %c0_19 = arith.constant 0 : index
    %c0_20 = arith.constant 0 : index
    %31 = vector.load %arg7[%c0_18, %c0_19, %c0_20] : memref<1x32x16xf32, #tpu.memory_space<vmem>>, vector<1x32x16xf32>
    %32 = vector.shape_cast %31 : vector<1x32x16xf32> to vector<32x16xf32>
    %33 = vector.shape_cast %30 : vector<32x16xf32> to vector<1x32x16xf32>
    tpu.vector_store %arg7[%c0_18, %c0_19, %c0_20], %33 {strides = array<i32>} : memref<1x32x16xf32, #tpu.memory_space<vmem>>, vector<1x32x16xf32>,
    return
  }
  func.func @transform_0(%arg0: i32, %arg1: i32) -> (i32, i32, i32, i32) {
    %c0_i32 = arith.constant 0 : i32
    %c0_i32_0 = arith.constant 0 : i32
    %c0_i32_1 = arith.constant 0 : i32
    return %arg0, %arg1, %c0_i32, %c0_i32_0 : i32, i32, i32, i32
  }
  func.func @transform_1(%arg0: i32, %arg1: i32) -> (i32, i32, i32, i32) {
    %c0_i32 = arith.constant 0 : i32
    %c0_i32_0 = arith.constant 0 : i32
    %c0_i32_1 = arith.constant 0 : i32
    return %arg0, %arg1, %c0_i32, %c0_i32_0 : i32, i32, i32, i32
  }
  func.func @transform_2(%arg0: i32, %arg1: i32) -> (i32, i32) {
    %c0_i32 = arith.constant 0 : i32
    %c0_i32_0 = arith.constant 0 : i32
    %c0_i32_1 = arith.constant 0 : i32
    return %c0_i32, %c0_i32_0 : i32, i32
  }
  func.func @transform_3(%arg0: i32, %arg1: i32) -> (i32, i32) {
    %c0_i32 = arith.constant 0 : i32
    %c0_i32_0 = arith.constant 0 : i32
    %c0_i32_1 = arith.constant 0 : i32
    return %c0_i32, %c0_i32_0 : i32, i32
  }
  func.func @transform_4(%arg0: i32, %arg1: i32) -> (i32, i32) {
    %c0_i32 = arith.constant 0 : i32
    %c0_i32_0 = arith.constant 0 : i32
    %c0_i32_1 = arith.constant 0 : i32
    return %c0_i32, %c0_i32_0 : i32, i32
  }
  func.func @transform_5(%arg0: i32, %arg1: i32) -> (i32, i32, i32) {
    %c0_i32 = arith.constant 0 : i32
    %c0_i32_0 = arith.constant 0 : i32
    return %arg0, %c0_i32, %arg1 : i32, i32, i32
  }
}

</mosaic_0001>

<bundles_post_ra>
// kernel: tpu_custom_call.1
= control target key start
LH: loop header
LB: loop body
LE: loop exit
PB: predicated region body
PF: predicated region fallthrough
CT: control target
= control target key end

     0   :  { %s1955_s18 = smov 0   ;;  %s1957_s19 = smov 0   ;;  %s2458_s0 = inlined_call_operand.vmem [shape: f32[2,16,8,4], index: 0, kind: input, shape index: {}]   ;;  %s2459_s1 = inlined_call_operand.vmem [shape: f32[2,16,8,32], index: 1, kind: input, shape index: {}]   ;;  %s2460_s2 = inlined_call_operand.vmem [shape: f32[4,8], index: 2, kind: input, shape index: {}]   ;;  %s2461_s3 = inlined_call_operand.vmem [shape: f32[32,8], index: 3, kind: input, shape index: {}]   ;;  %s2462_s4 = inlined_call_operand.vmem [shape: f32[1,8], index: 4, kind: input, shape index: {}]   ;;  %s2463_s5 = inlined_call_operand.vmem [shape: f32[2,32,16], index: 5, kind: output, shape index: {}]  }
   0x1   :  { %s1959_s20 = smov 0  }
   0x2 LB: > { %s27_s21 = sadd.s32 1, %s1918_s19  ;;  %p1671_p0 = scmp.ge.s32.totalorder %s1922_s20, 1  ;;  %s1922_s20 = sphi %s1959_s20, %s15_s20   ;;  %s1918_s19 = sphi %s1957_s19, %s2465_s19   ;;  %s1914_s18 = sphi %s1955_s18, %s2464_s18  }
   0x3   : > { %p29_p1 = scmp.ge.s32.totalorder %s27_s21, 2  ;;  %p225_p2 = scmp.lt.s32.totalorder %s1922_s20, 3 }
   0x5   : > { %s2467_s21 = smov (%p29_p1, %s27_s21), 0  ;;  %p226_p3 = pnand %p1671_p0, %p225_p2 }
   0x6   : > { %v330_v0 = vld [vmem:[%s2461_s3] sm:$0xff] (!%p226_p3)  ;;  %v331_v1 = vld [vmem:[%s2461_s3 + $0x8] sm:$0xff] (!%p226_p3)  ;;  %v332_v2 = vld [vmem:[%s2461_s3 + $0x10] sm:$0xff] (!%p226_p3)  ;;  %vm577_vm0 = vcmask (!%p226_p3), 1043456   ;;  %p270_p4 = scmp.lt.s32.totalorder (!%p226_p3), %s1914_s18, 1  ;;  %vm528_vm1 = vcmask (!%p226_p3), 31744  }
   0x7   : > { %229 = sbr.rel (%p226_p3) target bundleno = 1199 (0x4af), region = 40  ;;  %v1812_v3 = vpack.c.bf16 (!%p226_p3), %v331_v1, %v330_v0  ;;  %v333_v4 = vld [vmem:[%s2461_s3 + $0x18] sm:$0xff] (!%p226_p3)  ;;  %v329_v5 = vld [vmem:[%s2460_s2] sm:$0xf] (!%p226_p3)  ;;  %vm334_vm2 = vcmask (!%p226_p3), 261120   ;;  %vm749_vm3 = vcmask (!%p226_p3), 64512  }
   0x8   : > { %v1816_v6 = vpack.c.bf16 (!%p226_p3), %v333_v4, %v332_v2  ;;  %1786 = vmatprep.subr.msk.mxu0 (!%p226_p3), %vm577_vm0, %v329_v5  ;;  %v2116_v42 = vld [vmem:[%s2462_s4] ss:$0 sm:$0xff] (!%p226_p3)  ;;  %vm880_vm4 = vcmask (!%p226_p3), 1041409   ;;  %vm882_vm5 = vcmask (!%p226_p3), 1042434   ;;  %vm884_vm6 = vcmask (!%p226_p3), 1043459  }
   0x9   : > { %1813 = vmatprep.subr.bf16.mxu1 (!%p226_p3), %v1812_v3  ;;  %1787 = vmatpush3.msk.msra.mxu0 (!%p226_p3), %vm577_vm0, %v329_v5  ;;  %vm886_vm7 = vcmask (!%p226_p3), 1044484   ;;  %vm888_vm8 = vcmask (!%p226_p3), 1045509   ;;  %vm890_vm9 = vcmask (!%p226_p3), 1046534   ;;  %vm892_vm10 = vcmask (!%p226_p3), 1047559  }
   0xa   : > { %1815 = vmatpush3.bf16.msra.mxu1 (!%p226_p3), %v1812_v3  ;;  %vm1561_vm11 = vcmask (!%p226_p3), 130048  }
   0xb   : > { %1817 = vmatprep.subr.bf16.mxu1 (!%p226_p3), %v1816_v6 }
   0xe   : > { %s2469_s18 = smov (!%p270_p4, %s1914_s18), 1  ;;  %1819 = vmatpush3.bf16.msra.mxu1 %v1816_v6 }
   0xf   : > { %s1714_s7 = sshll.u32 %s2469_s18, 7  ;;  %s1716_s16 = sshll.u32 %s2469_s18, 5 }
  0x10   : > { %s1994_s10 = scalar_lea.vmem %s2458_s0, %s1714_s7  ;;  %s1999_s13 = scalar_lea.vmem %s2459_s1, %s1714_s7 }
  0x11   : > { %v297_v7 = vld [vmem:[%s1994_s10] sm:$0xff]  ;;  %v298_v9 = vld [vmem:[%s1994_s10 + $0x8] sm:$0xff]  ;;  %v299_v10 = vld [vmem:[%s1994_s10 + $0x10] sm:$0xff]  ;;  %s296_s23 = scalar_lea.vmem %s2463_s5, %s1716_s16 }
  0x12   : > { %v2003_v8 = vld [vmem:[%s1999_s13] sm:$0xff]  ;;  %1788 = vmatprep.mubr.msk.f32.mxu0 %vm528_vm1, %v297_v7  ;;  %v2012_v11 = vld [vmem:[%s1999_s13 + $0x8] sm:$0xff]  ;;  %v2016_v12 = vld [vmem:[%s1999_s13 + $0x10] sm:$0xff] }
  0x13   : > { %1762 = vmatprep.mubr.msk.f32.mxu1 %vm334_vm2, %v2003_v8  ;;  %1789 = vmatmul.mubr.msk.f32.vlgmr.msra.gmra.mrb[0].mxu0 %vm528_vm1, %v298_v9  ;;  %v300_v13 = vld [vmem:[%s1994_s10 + $0x18] sm:$0xff]  ;;  %v301_v14 = vld [vmem:[%s1994_s10 + $0x20] sm:$0xff]  ;;  %v302_v17 = vld [vmem:[%s1994_s10 + $0x28] sm:$0xff] }
  0x14   : > { %1791 = vmatprep.mubr.msk.f32.mxu0 %vm528_vm1, %v299_v10  ;;  %1763 = vmatmul.mubr.msk.f32.vlgmr.msra.gmra.mrb[0].mxu1 %vm334_vm2, %v2012_v11  ;;  %v2026_v15 = vld [vmem:[%s1999_s13 + $0x18] sm:$0xff]  ;;  %v2030_v16 = vld [vmem:[%s1999_s13 + $0x20] sm:$0xff]  ;;  %v303_v18 = vld [vmem:[%s1994_s10 + $0x30] sm:$0xff] }
  0x15   : > { %1765 = vmatprep.mubr.msk.f32.mxu1 %vm334_vm2, %v2016_v12  ;;  %v2040_v19 = vld [vmem:[%s1999_s13 + $0x28] sm:$0xff]  ;;  %v2043_v20 = vld [vmem:[%s1999_s13 + $0x30] sm:$0xff]  ;;  %v304_v21 = vld [vmem:[%s1994_s10 + $0x38] sm:$0xff] }
  0x16   : > { %v305_v22 = vld [vmem:[%s1994_s10 + $0x40] sm:$0xff]  ;;  %v2053_v23 = vld [vmem:[%s1999_s13 + $0x38] sm:$0xff]  ;;  %v306_v25 = vld [vmem:[%s1994_s10 + $0x48] sm:$0xff] }
  0x17   : > { %1792 = vmatmul.mubr.msk.f32.gmra.mrb[2].mxu0 %vm528_vm1, %v300_v13  ;;  %v2057_v24 = vld [vmem:[%s1999_s13 + $0x40] sm:$0xff]  ;;  %v307_v26 = vld [vmem:[%s1994_s10 + $0x50] sm:$0xff]  ;;  %v2067_v27 = vld [vmem:[%s1999_s13 + $0x48] sm:$0xff] }
  0x18   : > { %1794 = vmatprep.mubr.msk.f32.mxu0 %vm528_vm1, %v301_v14  ;;  %1766 = vmatmul.mubr.msk.f32.gmra.mrb[2].mxu1 %vm334_vm2, %v2026_v15  ;;  %v2071_v28 = vld [vmem:[%s1999_s13 + $0x50] sm:$0xff]  ;;  %v308_v29 = vld [vmem:[%s1994_s10 + $0x58] sm:$0xff]  ;;  %v309_v30 = vld [vmem:[%s1994_s10 + $0x60] sm:$0xff] }
  0x19   : > { %1768 = vmatprep.mubr.msk.f32.mxu1 %vm334_vm2, %v2030_v16  ;;  %v2081_v31 = vld [vmem:[%s1999_s13 + $0x58] sm:$0xff]  ;;  %v2085_v32 = vld [vmem:[%s1999_s13 + $0x60] sm:$0xff]  ;;  %v310_v33 = vld [vmem:[%s1994_s10 + $0x68] sm:$0xff] }
  0x1a   : > { %v311_v34 = vld [vmem:[%s1994_s10 + $0x70] sm:$0xff]  ;;  %v2095_v35 = vld [vmem:[%s1999_s13 + $0x68] sm:$0xff]  ;;  %v312_v37 = vld [vmem:[%s1994_s10 + $0x78] sm:$0xff] }
  0x1b   : > { %1795 = vmatmul.mubr.msk.f32.gmra.mrb[4].mxu0 %vm528_vm1, %v302_v17  ;;  %v2099_v36 = vld [vmem:[%s1999_s13 + $0x70] sm:$0xff]  ;;  %v2108_v38 = vld [vmem:[%s1999_s13 + $0x78] sm:$0xff] }
  0x1c   : > { %1797 = vmatprep.mubr.msk.f32.mxu0 %vm528_vm1, %v303_v18  ;;  %1769 = vmatmul.mubr.msk.f32.gmra.mrb[4].mxu1 %vm334_vm2, %v2040_v19 }
  0x1d   : > { %1771 = vmatprep.mubr.msk.f32.mxu1 %vm334_vm2, %v2043_v20 }
  0x1f   : > { %1798 = vmatmul.mubr.msk.f32.gmra.mrb[6].mxu0 %vm528_vm1, %v304_v21 }
  0x20   : > { %1800 = vmatprep.mubr.msk.f32.mxu0 %vm528_vm1, %v305_v22  ;;  %1772 = vmatmul.mubr.msk.f32.gmra.mrb[6].mxu1 %vm334_vm2, %v2053_v23 }
  0x21   : > { %1774 = vmatprep.mubr.msk.f32.mxu1 %vm334_vm2, %v2057_v24 }
  0x23   : > { %1801 = vmatmul.mubr.msk.f32.gmra.mrb[8].mxu0 %vm528_vm1, %v306_v25 }
  0x24   : > { %1803 = vmatprep.mubr.msk.f32.mxu0 %vm528_vm1, %v307_v26  ;;  %1775 = vmatmul.mubr.msk.f32.gmra.mrb[8].mxu1 %vm334_vm2, %v2067_v27 }
  0x25   : > { %1777 = vmatprep.mubr.msk.f32.mxu1 %vm334_vm2, %v2071_v28 }
  0x27   : > { %1804 = vmatmul.mubr.msk.f32.gmra.mrb[10].mxu0 %vm528_vm1, %v308_v29 }
  0x28   : > { %1806 = vmatprep.mubr.msk.f32.mxu0 %vm528_vm1, %v309_v30  ;;  %1778 = vmatmul.mubr.msk.f32.gmra.mrb[10].mxu1 %vm334_vm2, %v2081_v31 }
  0x29   : > { %1780 = vmatprep.mubr.msk.f32.mxu1 %vm334_vm2, %v2085_v32 }
  0x2b   : > { %1807 = vmatmul.mubr.msk.f32.gmra.mrb[12].mxu0 %vm528_vm1, %v310_v33 }
  0x2c   : > { %1809 = vmatprep.mubr.msk.f32.mxu0 %vm528_vm1, %v311_v34  ;;  %1781 = vmatmul.mubr.msk.f32.gmra.mrb[12].mxu1 %vm334_vm2, %v2095_v35 }
  0x2d   : > { %1783 = vmatprep.mubr.msk.f32.mxu1 %vm334_vm2, %v2099_v36 }
  0x2f   : > { %1810 = vmatmul.mubr.msk.f32.gmra.mrb[14].mxu0 %vm528_vm1, %v312_v37 }
  0x30   : > { %1784 = vmatmul.mubr.msk.f32.gmra.mrb[14].mxu1 %vm334_vm2, %v2108_v38 }
  0xe6   : > { %v1790_v39 = vpop.f32.mrb[0].mxu0 }
  0xe7   : > { %v647_v40 = vpop.f32.mrb[1].mxu0  ;;  %v1764_v41 = vpop.f32.mrb[0].mxu1 }
  0xe8   : > { %v653_v43 = vadd.f32 %v1790_v39, %v1764_v41  ;;  %v449_v44 = vpop.f32.mrb[1].mxu1 }
  0xe9   : > { %v648_v46 = vadd.f32 %v647_v40, %v449_v44 }
  0xea   : > { %v1793_v45 = vpop.f32.mrb[2].mxu0  ;;  %v734_v48 = vadd.f32 %v2116_v42, %v653_v43 }
  0xeb   : > { %v657_v47 = vpop.f32.mrb[3].mxu0  ;;  %v1767_v49 = vpop.f32.mrb[2].mxu1  ;;  %v733_v54 = vadd.f32 %v2116_v42, %v648_v46 }
  0xec   : > { %v663_v50 = vadd.f32 %v1793_v45, %v1767_v49  ;;  %v459_v51 = vpop.f32.mrb[3].mxu1  ;;  %v753_v52 = vsel %vm749_vm3, %v734_v48, -inf }
  0xed   : > { %v658_v55 = vadd.f32 %v657_v47, %v459_v51  ;;  %754 = vmax.xlane.f32.xlu0 %v753_v52  ;;  %v750_v62 = vsel %vm749_vm3, %v733_v54, -inf }
  0xee   : > { %v1796_v53 = vpop.f32.mrb[4].mxu0  ;;  %v736_v57 = vadd.f32 %v2116_v42, %v663_v50 }
  0xef   : > { %v667_v56 = vpop.f32.mrb[5].mxu0  ;;  %v1770_v58 = vpop.f32.mrb[4].mxu1  ;;  %v735_v0 = vadd.f32 %v2116_v42, %v658_v55 }
  0xf0   : > { %v673_v59 = vadd.f32 %v1796_v53, %v1770_v58  ;;  %v469_v60 = vpop.f32.mrb[5].mxu1  ;;  %v759_v61 = vsel %vm749_vm3, %v736_v57, -inf }
  0xf1   : > { %v668_v1 = vadd.f32 %v667_v56, %v469_v60  ;;  %760 = vmax.xlane.f32.xlu1 %v759_v61  ;;  %751 = vmax.xlane.f32.xlu0 %v750_v62  ;;  %v756_v6 = vsel %vm749_vm3, %v735_v0, -inf }
  0xf2   : > { %v1799_v63 = vpop.f32.mrb[6].mxu0  ;;  %v738_v3 = vadd.f32 %v2116_v42, %v673_v59 }
  0xf3   : > { %v677_v2 = vpop.f32.mrb[7].mxu0  ;;  %v1773_v4 = vpop.f32.mrb[6].mxu1  ;;  %v737_v13 = vadd.f32 %v2116_v42, %v668_v1 }
  0xf4   : > { %v683_v5 = vadd.f32 %v1799_v63, %v1773_v4  ;;  %v765_v7 = vsel %vm749_vm3, %v738_v3, -inf  ;;  %v479_v9 = vpop.f32.mrb[7].mxu1 }
  0xf5   : > { %757 = vmax.xlane.f32.xlu1 %v756_v6  ;;  %766 = vmax.xlane.f32.xlu0 %v765_v7  ;;  %v678_v14 = vadd.f32 %v677_v2, %v479_v9  ;;  %v762_v25 = vsel %vm749_vm3, %v737_v13, -inf  ;;  %v814_v13 = vlaneseq }
  0xf6   : > { %v1802_v10 = vpop.f32.mrb[8].mxu0  ;;  %v740_v54 = vadd.f32 %v2116_v42, %v683_v5 }
  0xf7   : > { %v687_v17 = vpop.f32.mrb[9].mxu0  ;;  %v1776_v18 = vpop.f32.mrb[8].mxu1  ;;  %v739_v21 = vadd.f32 %v2116_v42, %v678_v14 }
  0xf8   : > { %v693_v22 = vadd.f32 %v1802_v10, %v1776_v18  ;;  %v489_v26 = vpop.f32.mrb[9].mxu1  ;;  %v771_v62 = vsel %vm749_vm3, %v740_v54, -inf  ;;  %v815_v18 = vand.u32 127, %v814_v13 }
  0xf9   : > { %763 = vmax.xlane.f32.xlu0 %v762_v25  ;;  %v688_v30 = vadd.f32 %v687_v17, %v489_v26  ;;  %v768_v37 = vsel %vm749_vm3, %v739_v21, -inf  ;;  %v2156_v21 = vshrl.u32 %v814_v13, 7 }
  0xfa   : > { %v1805_v29 = vpop.f32.mrb[10].mxu0  ;;  %v742_v34 = vadd.f32 %v2116_v42, %v693_v22 }
  0xfb   : > { %v697_v33 = vpop.f32.mrb[11].mxu0  ;;  %v1779_v39 = vpop.f32.mrb[10].mxu1  ;;  %v741_v40 = vadd.f32 %v2116_v42, %v688_v30  ;;  %v2161_v25 = vsub.s32 %v815_v18, %v2156_v21 }
  0xfc   : > { %v703_v41 = vadd.f32 %v1805_v29, %v1779_v39  ;;  %v777_v43 = vsel %vm749_vm3, %v742_v34, -inf  ;;  %v499_v44 = vpop.f32.mrb[11].mxu1 }
  0xfd   : > { %778 = vmax.xlane.f32.xlu1 %v777_v43  ;;  %769 = vmax.xlane.f32.xlu0 %v768_v37  ;;  %v698_v46 = vadd.f32 %v697_v33, %v499_v44  ;;  %v774_v49 = vsel %vm749_vm3, %v741_v40, -inf }
  0xfe   : > { %v1808_v45 = vpop.f32.mrb[12].mxu0  ;;  %v744_v48 = vadd.f32 %v2116_v42, %v703_v41 }
  0xff   : > { %v707_v47 = vpop.f32.mrb[13].mxu0  ;;  %v1782_v50 = vpop.f32.mrb[12].mxu1  ;;  %v743_v51 = vadd.f32 %v2116_v42, %v698_v46 }
 0x100   : > { %v783_v52 = vsel %vm749_vm3, %v744_v48, -inf  ;;  %v713_v53 = vadd.f32 %v1808_v45, %v1782_v50  ;;  %v509_v55 = vpop.f32.mrb[13].mxu1 }
 0x101   : > { %784 = vmax.xlane.f32.xlu1 %v783_v52  ;;  %775 = vmax.xlane.f32.xlu0 %v774_v49  ;;  %v708_v57 = vadd.f32 %v707_v47, %v509_v55  ;;  %v780_v59 = vsel %vm749_vm3, %v743_v51, -inf }
 0x102   : > { %v1811_v56 = vpop.f32.mrb[14].mxu0  ;;  %v746_v60 = vadd.f32 %v2116_v42, %v713_v53 }
 0x103   : > { %v717_v58 = vpop.f32.mrb[15].mxu0  ;;  %v1785_v61 = vpop.f32.mrb[14].mxu1  ;;  %v745_v3 = vadd.f32 %v2116_v42, %v708_v57 }
 0x104   : > { %v723_v63 = vadd.f32 %v1811_v56, %v1785_v61  ;;  %v519_v0 = vpop.f32.mrb[15].mxu1  ;;  %v789_v2 = vsel %vm749_vm3, %v746_v60, -inf }
 0x105   : > { %781 = vmax.xlane.f32.xlu1 %v780_v59  ;;  %772 = vmax.xlane.f32.xlu0 %v771_v62  ;;  %v718_v1 = vadd.f32 %v717_v58, %v519_v0  ;;  %v786_v6 = vsel %vm749_vm3, %v745_v3, -inf }
 0x106   : > { %v748_v7 = vadd.f32 %v2116_v42, %v723_v63 }
 0x107   : > { %v747_v4 = vadd.f32 %v2116_v42, %v718_v1 }
 0x108   : > { %v795_v9 = vsel %vm749_vm3, %v748_v7, -inf }
 0x109   : > { %790 = vmax.xlane.f32.xlu1 %v789_v2  ;;  %v792_v5 = vsel %vm749_vm3, %v747_v4, -inf }
 0x10a   : > { %793 = vmax.xlane.f32.xlu0 %v792_v5 }
 0x10d   : > { %787 = vmax.xlane.f32.xlu1 %v786_v6 }
 0x111   : > { %796 = vmax.xlane.f32.xlu1 %v795_v9 }
 0x17a   : > { %v2150_v10 = vpop.xlane.xlu0 %754 }
 0x17b   : > { %v823_v33 = vrot.slane %v2150_v10, %v2161_v25 }
 0x17e   : > { %v2152_v14 = vpop.xlane.xlu0 %751  ;;  %v2154_v17 = vpop.xlane.xlu1 %760 }
 0x17f   : > { %v819_v29 = vrot.slane %v2152_v14, %v2161_v25  ;;  %v831_v43 = vrot.slane %v2154_v17, %v2161_v25 }
 0x181   : > { %v881_v39 = vsel %vm880_vm4, %v823_v33, %v819_v29  ;;  %v1924_v33 = vmov 0  }
 0x182   : > { %v2158_v22 = vpop.xlane.xlu0 %766  ;;  %v2163_v42 = vpop.xlane.xlu1 %757  ;;  %1863 = vset.pattern.permute.xlu1 %v1924_v33  ;;  %1862 = vset.pattern.permute.xlu0 %v1924_v33 }
 0x183   : > { %v827_v30 = vrot.slane %v2163_v42, %v2161_v25  ;;  %v839_v49 = vrot.slane %v2158_v22, %v2161_v25 }
 0x185   : > { %v883_v40 = vsel %vm882_vm5, %v827_v30, %v881_v39  ;;  %v2233_v39 = vsub.s32 0, %v2156_v21 }
 0x186   : > { %v2165_v26 = vpop.xlane.xlu0 %763  ;;  %v885_v46 = vsel %vm884_vm6, %v831_v43, %v883_v40  ;;  %v2236_v40 = vsub.s32 1, %v2156_v21  ;;  %v2242_v43 = vsub.s32 3, %v2156_v21 }
 0x187   : > { %v835_v41 = vrot.slane %v2165_v26, %v2161_v25 }
 0x189   : > { %v887_v47 = vsel %vm886_vm7, %v835_v41, %v885_v46  ;;  %v2239_v41 = vsub.s32 2, %v2156_v21 }
 0x18a   : > { %v2173_v34 = vpop.xlane.xlu1 %778  ;;  %v2175_v37 = vpop.xlane.xlu0 %769  ;;  %v889_v53 = vsel %vm888_vm8, %v839_v49, %v887_v47 }
 0x18b   : > { %v843_v48 = vrot.slane %v2175_v37, %v2161_v25  ;;  %v855_v54 = vrot.slane %v2173_v34, %v2161_v25 }
 0x18d   : > { %v891_v56 = vsel %vm890_vm9, %v843_v48, %v889_v53 }
 0x18e   : > { %v2183_v44 = vpop.xlane.xlu1 %784  ;;  %v2185_v45 = vpop.xlane.xlu0 %775 }
 0x18f   : > { %v851_v55 = vrot.slane %v2185_v45, %v2161_v25  ;;  %v863_v61 = vrot.slane %v2183_v44, %v2161_v25 }
 0x191   : > { %v894_v62 = vsel %vm880_vm4, %v855_v54, %v851_v55  ;;  %v2250_v54 = vsub.s32 4, %v2156_v21 }
 0x192   : > { %v2193_v50 = vpop.xlane.xlu1 %781  ;;  %v2195_v51 = vpop.xlane.xlu0 %772 }
 0x193   : > { %v847_v52 = vrot.slane %v2195_v51, %v2161_v25  ;;  %v859_v57 = vrot.slane %v2193_v50, %v2161_v25 }
 0x195   : > { %v893_v58 = vsel %vm892_vm10, %v847_v52, %v891_v56  ;;  %v895_v0 = vsel %vm882_vm5, %v859_v57, %v894_v62 }
 0x196   : > { %v2208_v59 = vpop.xlane.xlu1 %790  ;;  %v903_v60 = vsel %vm749_vm3, %v893_v58, -inf  ;;  %v896_v5 = vsel %vm884_vm6, %v863_v61, %v895_v0 }
 0x197   : > { %904 = vmax.xlane.f32.xlu0 %v903_v60  ;;  %v2214_v63 = vpop.xlane.xlu0 %793  ;;  %v871_v1 = vrot.slane %v2208_v59, %v2161_v25  ;;  %v2255_v60 = vsub.s32 5, %v2156_v21 }
 0x198   : > { %v875_v4 = vrot.slane %v2214_v63, %v2161_v25 }
 0x19a   : > { %v788_v2 = vpop.xlane.xlu1 %787 }
 0x19b   : > { %v867_v3 = vrot.slane %v788_v2, %v2161_v25 }
 0x19d   : > { %v897_v6 = vsel %vm886_vm7, %v867_v3, %v896_v5 }
 0x19e   : > { %v2224_v7 = vpop.xlane.xlu1 %796  ;;  %v898_v9 = vsel %vm888_vm8, %v871_v1, %v897_v6  ;;  %v2267_v6 = vsub.s32 7, %v2156_v21 }
 0x19f   : > { %v879_v13 = vrot.slane %v2224_v7, %v2161_v25  ;;  %v899_v18 = vsel %vm890_vm9, %v875_v4, %v898_v9 }
 0x1a1   : > { %v900_v29 = vsel %vm892_vm10, %v879_v13, %v899_v18 }
 0x1a2   : > { %v906_v30 = vsel %vm749_vm3, %v900_v29, -inf }
 0x1a3   : > { %907 = vmax.xlane.f32.xlu1 %v906_v30 }
 0x224   : > { %v905_v46 = vpop.xlane.xlu0 %904 }
 0x225   : > { %v914_v47 = vrot.slane %v905_v46, %v2233_v39  ;;  %v918_v48 = vrot.slane %v905_v46, %v2236_v40  ;;  %v922_v49 = vrot.slane %v905_v46, %v2239_v41  ;;  %v926_v55 = vrot.slane %v905_v46, %v2242_v43 }
 0x226   : > { %v930_v61 = vrot.slane %v905_v46, %v2250_v54  ;;  %v934_v0 = vrot.slane %v905_v46, %v2255_v60 }
 0x227   : > { %v991_v52 = vsub.f32 %v2152_v14, %v914_v47  ;;  %v992_v53 = vsub.f32 %v2150_v10, %v918_v48  ;;  %v993_v56 = vsub.f32 %v2163_v42, %v922_v49  ;;  %v994_v62 = vsub.f32 %v2154_v17, %v926_v55 }
 0x228   : > { %v2260_v10 = vsub.s32 6, %v2156_v21  ;;  %v995_v1 = vsub.f32 %v2165_v26, %v930_v61  ;;  %v996_v9 = vsub.f32 %v2158_v22, %v934_v0  ;;  %v942_v21 = vrot.slane %v905_v46, %v2267_v6 }
 0x229   : > { %v1007_v57 = vmul.f32 1.442695, %v991_v52  ;;  %v1009_v58 = vmul.f32 1.442695, %v992_v53  ;;  %v1011_v14 = vmul.f32 1.442695, %v993_v56 }
 0x22a   : > { %v1013_v42 = vmul.f32 1.442695, %v994_v62  ;;  %v938_v17 = vrot.slane %v905_v46, %v2260_v10  ;;  %v1015_v13 = vmul.f32 1.442695, %v995_v1  ;;  %v1017_v48 = vmul.f32 1.442695, %v996_v9 }
 0x22b   : > { %1864 = vpow2.f32 %v1007_v57 }
 0x22c   : > { %1866 = vpow2.f32 %v1009_v58  ;;  %v997_v22 = vsub.f32 %v2175_v37, %v938_v17 }
 0x22d   : > { %1868 = vpow2.f32 %v1011_v14 }
 0x22e   : > { %1870 = vpow2.f32 %v1013_v42  ;;  %v1019_v55 = vmul.f32 1.442695, %v997_v22 }
 0x22f   : > { %1872 = vpow2.f32 %v1015_v13 }
 0x230   : > { %v908_v3 = vpop.xlane.xlu1 %907 }
 0x231   : > { %v958_v4 = vrot.slane %v908_v3, %v2242_v43  ;;  %v962_v5 = vrot.slane %v908_v3, %v2250_v54  ;;  %v966_v30 = vrot.slane %v908_v3, %v2255_v60  ;;  %v946_v46 = vrot.slane %v908_v3, %v2233_v39 }
 0x232   : > { %v950_v58 = vrot.slane %v908_v3, %v2236_v40 }
 0x233   : > { %v1002_v18 = vsub.f32 %v2183_v44, %v958_v4  ;;  %v1003_v33 = vsub.f32 %v788_v2, %v962_v5  ;;  %v974_v44 = vrot.slane %v908_v3, %v2267_v6  ;;  %v1004_v52 = vsub.f32 %v2208_v59, %v966_v30 }
 0x234   : > { %v998_v2 = vsub.f32 %v2195_v51, %v942_v21  ;;  %v999_v61 = vsub.f32 %v2185_v45, %v946_v46  ;;  %v1000_v0 = vsub.f32 %v2173_v34, %v950_v58  ;;  %v970_v4 = vrot.slane %v908_v3, %v2260_v10 }
 0x235   : > { %v2272_v29 = vpop.eup %1864  ;;  %v1029_v47 = vmul.f32 1.442695, %v1002_v18  ;;  %v1031_v53 = vmul.f32 1.442695, %v1003_v33  ;;  %v1006_v37 = vsub.f32 %v2224_v7, %v974_v44  ;;  %v1033_v57 = vmul.f32 1.442695, %v1004_v52 }
 0x236   : > { %v2274_v26 = vpop.eup %1866  ;;  %1056 = vperm.xlu0 %1862, %v2272_v29   ;;  %v1021_v59 = vmul.f32 1.442695, %v998_v2  ;;  %v954_v7 = vrot.slane %v908_v3, %v2239_v41  ;;  %v1023_v1 = vmul.f32 1.442695, %v999_v61  ;;  %v1025_v17 = vmul.f32 1.442695, %v1000_v0 }
 0x237   : > { %1059 = vperm.xlu1 %1863, %v2274_v26   ;;  %v2281_v49 = vpop.eup %1868  ;;  %1874 = vpow2.f32 %v1029_v47  ;;  %v1037_v51 = vmul.f32 1.442695, %v1006_v37  ;;  %v1005_v13 = vsub.f32 %v2214_v63, %v970_v4 }
 0x238   : > { %1876 = vpow2.f32 %v1017_v48  ;;  %v2288_v56 = vpop.eup %1870  ;;  %v1001_v5 = vsub.f32 %v2193_v50, %v954_v7 }
 0x239   : > { %1878 = vpow2.f32 %v1031_v53  ;;  %v2294_v62 = vpop.eup %1872  ;;  %v1035_v3 = vmul.f32 1.442695, %v1005_v13 }
 0x23a   : > { %1880 = vpow2.f32 %v1019_v55  ;;  %v1027_v18 = vmul.f32 1.442695, %v1001_v5 }
 0x23b   : > { %1062 = vperm.xlu1 %1863, %v2281_v49   ;;  %1882 = vpow2.f32 %v1033_v57 }
 0x23c   : > { %1884 = vpow2.f32 %v1021_v59 }
 0x23d   : > { %1886 = vpow2.f32 %v1037_v51 }
 0x23e   : > { %1888 = vpow2.f32 %v1023_v1 }
 0x23f   : > { %1065 = vperm.xlu1 %1863, %v2288_v56   ;;  %1890 = vpow2.f32 %v1025_v17 }
 0x240   : > { %1892 = vpow2.f32 %v1027_v18 }
 0x241   : > { %v2297_v14 = vpop.eup %1874  ;;  %1894 = vpow2.f32 %v1035_v3 }
 0x242   : > { %1089 = vperm.xlu0 %1862, %v2297_v14   ;;  %v2302_v42 = vpop.eup %1876 }
 0x243   : > { %1068 = vperm.xlu1 %1863, %v2294_v62   ;;  %v2305_v45 = vpop.eup %1878 }
 0x244   : > { %v2310_v9 = vpop.eup %1880 }
 0x245   : > { %v2313_v34 = vpop.eup %1882 }
 0x246   : > { %1092 = vperm.xlu0 %1862, %v2305_v45   ;;  %v2317_v30 = vpop.eup %1884 }
 0x247   : > { %1071 = vperm.xlu1 %1863, %v2302_v42   ;;  %v2320_v50 = vpop.eup %1886 }
 0x248   : > { %v2323_v33 = vpop.eup %1888 }
 0x249   : > { %v2326_v63 = vpop.eup %1890 }
 0x24a   : > { %1095 = vperm.xlu0 %1862, %v2313_v34   ;;  %v2329_v47 = vpop.eup %1892 }
 0x24b   : > { %1074 = vperm.xlu1 %1863, %v2310_v9   ;;  %v2332_v21 = vpop.eup %1894 }
 0x24e   : > { %1101 = vperm.xlu0 %1862, %v2320_v50  }
 0x24f   : > { %1077 = vperm.xlu1 %1863, %v2317_v30  }
 0x253   : > { %1080 = vperm.xlu1 %1863, %v2323_v33  }
 0x257   : > { %1083 = vperm.xlu1 %1863, %v2326_v63  }
 0x25b   : > { %1086 = vperm.xlu1 %1863, %v2329_v47  }
 0x25f   : > { %1098 = vperm.xlu1 %1863, %v2332_v21  }
 0x2b5   : > { %v1057_v53 = vpop.permute.xlu0 %1056 }
 0x2b6   : > { %v1060_v22 = vpop.permute.xlu1 %1059  ;;  %v1106_v46 = vrot.slane %v1057_v53, %v2161_v25 }
 0x2b7   : > { %v1110_v55 = vrot.slane %v1060_v22, %v2161_v25 }
 0x2b9   : > { %v1167_v61 = vsel %vm880_vm4, %v1110_v55, %v1106_v46 }
 0x2ba   : > { %v1063_v48 = vpop.permute.xlu1 %1062 }
 0x2bb   : > { %v1114_v37 = vrot.slane %v1063_v48, %v2161_v25 }
 0x2bd   : > { %v1168_v0 = vsel %vm882_vm5, %v1114_v37, %v1167_v61 }
 0x2be   : > { %v1066_v44 = vpop.permute.xlu1 %1065 }
 0x2bf   : > { %v1118_v57 = vrot.slane %v1066_v44, %v2161_v25 }
 0x2c1   : > { %v1090_v51 = vpop.permute.xlu0 %1089  ;;  %v1169_v4 = vsel %vm884_vm6, %v1118_v57, %v1168_v0 }
 0x2c2   : > { %v1069_v52 = vpop.permute.xlu1 %1068 }
 0x2c3   : > { %v1122_v59 = vrot.slane %v1069_v52, %v2161_v25 }
 0x2c5   : > { %v1170_v5 = vsel %vm886_vm7, %v1122_v59, %v1169_v4  ;;  %v1093_v22 = vpop.permute.xlu0 %1092  ;;  %v1150_v59 = vrot.slane %v1090_v51, %v2161_v25 }
 0x2c6   : > { %v1072_v2 = vpop.permute.xlu1 %1071  ;;  %v1154_v61 = vrot.slane %v1093_v22, %v2161_v25 }
 0x2c7   : > { %v1126_v7 = vrot.slane %v1072_v2, %v2161_v25 }
 0x2c9   : > { %v1171_v13 = vsel %vm888_vm8, %v1126_v7, %v1170_v5  ;;  %v1096_v2 = vpop.permute.xlu0 %1095 }
 0x2ca   : > { %v1075_v58 = vpop.permute.xlu1 %1074 }
 0x2cb   : > { %v1130_v1 = vrot.slane %v1075_v58, %v2161_v25 }
 0x2cd   : > { %v1172_v3 = vsel %vm890_vm9, %v1130_v1, %v1171_v13  ;;  %v1102_v7 = vpop.permute.xlu0 %1101  ;;  %v1158_v1 = vrot.slane %v1096_v2, %v2161_v25 }
 0x2ce   : > { %v1078_v17 = vpop.permute.xlu1 %1077 }
 0x2cf   : > { %v1134_v18 = vrot.slane %v1078_v17, %v2161_v25 }
 0x2d1   : > { %v1173_v48 = vsel %vm892_vm10, %v1134_v18, %v1172_v3  ;;  %v1166_v18 = vrot.slane %v1102_v7, %v2161_v25 }
 0x2d2   : > { %v1081_v44 = vpop.permute.xlu1 %1080  ;;  %v1183_v52 = vsel %vm749_vm3, %v1173_v48, 0.0 }
 0x2d3   : > { %1184 = vadd.xlane.f32.xlu1 %v1183_v52  ;;  %v1138_v46 = vrot.slane %v1081_v44, %v2161_v25 }
 0x2d6   : > { %v1084_v53 = vpop.permute.xlu1 %1083 }
 0x2d7   : > { %v1142_v55 = vrot.slane %v1084_v53, %v2161_v25 }
 0x2d9   : > { %v1174_v58 = vsel %vm880_vm4, %v1142_v55, %v1138_v46 }
 0x2da   : > { %v1087_v37 = vpop.permute.xlu1 %1086 }
 0x2db   : > { %v1146_v57 = vrot.slane %v1087_v37, %v2161_v25 }
 0x2dd   : > { %v1175_v0 = vsel %vm882_vm5, %v1146_v57, %v1174_v58 }
 0x2de   : > { %v1176_v4 = vsel %vm884_vm6, %v1150_v59, %v1175_v0  ;;  %v1099_v5 = vpop.permute.xlu1 %1098 }
 0x2df   : > { %v1162_v17 = vrot.slane %v1099_v5, %v2161_v25  ;;  %v1177_v13 = vsel %vm886_vm7, %v1154_v61, %v1176_v4 }
 0x2e0   : > { %v1178_v51 = vsel %vm888_vm8, %v1158_v1, %v1177_v13 }
 0x2e1   : > { %v1179_v3 = vsel %vm890_vm9, %v1162_v17, %v1178_v51 }
 0x2e2   : > { %v1180_v22 = vsel %vm892_vm10, %v1166_v18, %v1179_v3 }
 0x2e3   : > { %v1186_v48 = vsel %vm749_vm3, %v1180_v22, 0.0 }
 0x2e4   : > { %1187 = vadd.xlane.f32.xlu0 %v1186_v48 }
 0x360   : > { %v1185_v44 = vpop.xlane.xlu1 %1184 }
 0x361   : > { %1896 = vrcp.f32 %v1185_v44 }
 0x36b   : > { %v1897_v52 = vpop.eup %1896 }
 0x36c   : > { %v1200_v53 = vrot.slane %v1897_v52, %v2236_v40  ;;  %v1196_v2 = vrot.slane %v1897_v52, %v2233_v39  ;;  %v1204_v46 = vrot.slane %v1897_v52, %v2239_v41  ;;  %v1208_v37 = vrot.slane %v1897_v52, %v2242_v43 }
 0x36d   : > { %v1212_v61 = vrot.slane %v1897_v52, %v2250_v54  ;;  %v1220_v0 = vrot.slane %v1897_v52, %v2260_v10 }
 0x36e   : > { %v1274_v55 = vmul.f32 %v2274_v26, %v1200_v53  ;;  %v1273_v25 = vmul.f32 %v2272_v29, %v1196_v2  ;;  %v1275_v59 = vmul.f32 %v2281_v49, %v1204_v46  ;;  %v1276_v58 = vmul.f32 %v2288_v56, %v1208_v37 }
 0x36f   : > { %v1277_v26 = vmul.f32 %v2294_v62, %v1212_v61  ;;  %v1216_v29 = vrot.slane %v1897_v52, %v2255_v60  ;;  %v1279_v49 = vmul.f32 %v2310_v9, %v1220_v0 }
 0x370   : > { %1296 = vperm.xlu1 %1863, %v1274_v55   ;;  %1291 = vperm.xlu0 %1862, %v1273_v25  }
 0x371   : > { %v1188_v57 = vpop.xlane.xlu0 %1187  ;;  %v1278_v7 = vmul.f32 %v2302_v42, %v1216_v29  ;;  %v1224_v42 = vrot.slane %v1897_v52, %v2267_v6 }
 0x372   : > { %1898 = vrcp.f32 %v1188_v57 }
 0x374   : > { %1301 = vperm.xlu1 %1863, %v1275_v59   ;;  %1306 = vperm.xlu0 %1862, %v1276_v58  }
 0x378   : > { %1311 = vperm.xlu1 %1863, %v1277_v26  }
 0x37c   : > { %v1899_v1 = vpop.eup %1898  ;;  %1316 = vperm.xlu1 %1863, %v1278_v7  }
 0x37d   : > { %v1232_v4 = vrot.slane %v1899_v1, %v2236_v40  ;;  %v1228_v56 = vrot.slane %v1899_v1, %v2233_v39  ;;  %v1236_v17 = vrot.slane %v1899_v1, %v2239_v41  ;;  %v1240_v18 = vrot.slane %v1899_v1, %v2242_v43 }
 0x37e   : > { %v1280_v40 = vmul.f32 %v2317_v30, %v1224_v42  ;;  %v1252_v39 = vrot.slane %v1899_v1, %v2260_v10  ;;  %v1244_v41 = vrot.slane %v1899_v1, %v2250_v54  ;;  %v1256_v30 = vrot.slane %v1899_v1, %v2267_v6 }
 0x37f   : > { %v1282_v5 = vmul.f32 %v2326_v63, %v1232_v4  ;;  %v1281_v62 = vmul.f32 %v2323_v33, %v1228_v56  ;;  %v1283_v13 = vmul.f32 %v2329_v47, %v1236_v17  ;;  %v1284_v9 = vmul.f32 %v2297_v14, %v1240_v18 }
 0x380   : > { %1321 = vperm.xlu1 %1863, %v1279_v49   ;;  %v1287_v33 = vmul.f32 %v2332_v21, %v1252_v39  ;;  %v1285_v63 = vmul.f32 %v2305_v45, %v1244_v41  ;;  %v1248_v47 = vrot.slane %v1899_v1, %v2255_v60  ;;  %v1288_v10 = vmul.f32 %v2320_v50, %v1256_v30 }
 0x381   : > { %1336 = vperm.xlu0 %1862, %v1282_v5  }
 0x382   : > { %v1286_v43 = vmul.f32 %v2313_v34, %v1248_v47 }
 0x384   : > { %1331 = vperm.xlu1 %1863, %v1281_v62  }
 0x385   : > { %1341 = vperm.xlu0 %1862, %v1283_v13  }
 0x388   : > { %1326 = vperm.xlu1 %1863, %v1280_v40  }
 0x389   : > { %1346 = vperm.xlu0 %1862, %v1284_v9  }
 0x38c   : > { %1361 = vperm.xlu1 %1863, %v1287_v33  }
 0x38d   : > { %1351 = vperm.xlu0 %1862, %v1285_v63  }
 0x391   : > { %1356 = vperm.xlu0 %1862, %v1286_v43  }
 0x395   : > { %1366 = vperm.xlu0 %1862, %v1288_v10  }
 0x3ef   : > { %v1297_v14 = vpop.permute.xlu1 %1296  ;;  %v1292_v54 = vpop.permute.xlu0 %1291 }
 0x3f0   : > { %v1370_v51 = vmul.f32 %v1297_v14, %v2012_v11  ;;  %v1369_v21 = vmul.f32 %v1292_v54, %v2003_v8 }
 0x3f2   : > { %v1392_v45 = vsel %vm334_vm2, %v1370_v51, 0.0  ;;  %v1385_v60 = vsel %vm334_vm2, %v1369_v21, 0.0 }
 0x3f3   : > { %v1393_v3 = vrot.slane %v1392_v45, 4  ;;  %v1386_v22 = vrot.slane %v1385_v60, 4  ;;  %v1302_v48 = vpop.permute.xlu1 %1301  ;;  %v1307_v34 = vpop.permute.xlu0 %1306 }
 0x3f4   : > { %v1371_v6 = vmul.f32 %v1302_v48, %v2016_v12  ;;  %v1372_v44 = vmul.f32 %v1307_v34, %v2026_v15 }
 0x3f5   : > { %v1394_v50 = vadd.f32 %v1393_v3, %v1392_v45  ;;  %v1387_v52 = vadd.f32 %v1386_v22, %v1385_v60 }
 0x3f6   : > { %v1399_v53 = vsel %vm334_vm2, %v1371_v6, 0.0  ;;  %v1406_v11 = vsel %vm334_vm2, %v1372_v44, 0.0 }
 0x3f7   : > { %v1395_v2 = vrot.slane %v1394_v50, 2  ;;  %v1400_v8 = vrot.slane %v1399_v53, 4  ;;  %v1407_v55 = vrot.slane %v1406_v11, 4  ;;  %v1312_v25 = vpop.permute.xlu1 %1311  ;;  %v1388_v46 = vrot.slane %v1387_v52, 2 }
 0x3f8   : > { %v1373_v37 = vmul.f32 %v1312_v25, %v2030_v16 }
 0x3f9   : > { %v1401_v57 = vadd.f32 %v1400_v8, %v1399_v53  ;;  %v1408_v59 = vadd.f32 %v1407_v55, %v1406_v11  ;;  %v1396_v12 = vadd.f32 %v1395_v2, %v1394_v50  ;;  %v1389_v15 = vadd.f32 %v1388_v46, %v1387_v52 }
 0x3fa   : > { %v1413_v58 = vsel %vm334_vm2, %v1373_v37, 0.0 }
 0x3fb   : > { %v1317_v61 = vpop.permute.xlu1 %1316  ;;  %v1414_v26 = vrot.slane %v1413_v58, 4  ;;  %v1402_v7 = vrot.slane %v1401_v57, 2  ;;  %v1409_v0 = vrot.slane %v1408_v59, 2  ;;  %v1397_v49 = vrot.slane %v1396_v12, 1 }
 0x3fc   : > { %v1374_v29 = vmul.f32 %v1317_v61, %v2040_v19  ;;  %v1390_v17 = vrot.slane %v1389_v15, 1 }
 0x3fd   : > { %v1415_v1 = vadd.f32 %v1414_v26, %v1413_v58  ;;  %v1403_v42 = vadd.f32 %v1402_v7, %v1401_v57  ;;  %v1410_v13 = vadd.f32 %v1409_v0, %v1408_v59  ;;  %v1398_v9 = vadd.f32 %v1397_v49, %v1396_v12 }
 0x3fe   : > { %v1420_v4 = vsel %vm334_vm2, %v1374_v29, 0.0  ;;  %v1391_v47 = vadd.f32 %v1390_v17, %v1389_v15 }
 0x3ff   : > { %v1421_v56 = vrot.slane %v1420_v4, 4  ;;  %v1322_v5 = vpop.permute.xlu1 %1321  ;;  %v1416_v39 = vrot.slane %v1415_v1, 2  ;;  %v1404_v14 = vrot.slane %v1403_v42, 1  ;;  %v1411_v54 = vrot.slane %v1410_v13, 1 }
 0x400   : > { %v1375_v16 = vmul.f32 %v1322_v5, %v2043_v20  ;;  %v1337_v62 = vpop.permute.xlu0 %1336  ;;  %v1513_v6 = vsel %vm880_vm4, %v1398_v9, %v1391_v47 }
 0x401   : > { %v1422_v18 = vadd.f32 %v1421_v56, %v1420_v4  ;;  %v1378_v40 = vmul.f32 %v1337_v62, %v2067_v27  ;;  %v1417_v27 = vadd.f32 %v1416_v39, %v1415_v1  ;;  %v1405_v53 = vadd.f32 %v1404_v14, %v1403_v42 }
 0x402   : > { %v1427_v19 = vsel %vm334_vm2, %v1375_v16, 0.0  ;;  %v1412_v11 = vadd.f32 %v1411_v54, %v1410_v13 }
 0x403   : > { %v1428_v41 = vrot.slane %v1427_v19, 4  ;;  %v1448_v33 = vsel %vm334_vm2, %v1378_v40, 0.0  ;;  %v1332_v63 = vpop.permute.xlu1 %1331  ;;  %v1423_v43 = vrot.slane %v1422_v18, 2  ;;  %v1418_v8 = vrot.slane %v1417_v27, 1 }
 0x404   : > { %v1449_v30 = vrot.slane %v1448_v33, 4  ;;  %v1377_v10 = vmul.f32 %v1332_v63, %v2057_v24  ;;  %v1342_v20 = vpop.permute.xlu0 %1341  ;;  %v1514_v7 = vsel %vm882_vm5, %v1405_v53, %v1513_v6 }
 0x405   : > { %v1429_v51 = vadd.f32 %v1428_v41, %v1427_v19  ;;  %v1379_v21 = vmul.f32 %v1342_v20, %v2071_v28  ;;  %v1424_v44 = vadd.f32 %v1423_v43, %v1422_v18  ;;  %v1419_v4 = vadd.f32 %v1418_v8, %v1417_v27 }
 0x406   : > { %v1441_v45 = vsel %vm334_vm2, %v1377_v10, 0.0  ;;  %v1450_v3 = vadd.f32 %v1449_v30, %v1448_v33  ;;  %v1515_v43 = vsel %vm884_vm6, %v1412_v11, %v1514_v7 }
 0x407   : > { %v1430_v60 = vrot.slane %v1429_v51, 2  ;;  %v1442_v22 = vrot.slane %v1441_v45, 4  ;;  %v1455_v48 = vsel %vm334_vm2, %v1379_v21, 0.0  ;;  %v1327_v34 = vpop.permute.xlu1 %1326  ;;  %v1425_v61 = vrot.slane %v1424_v44, 1 }
 0x408   : > { %v1456_v50 = vrot.slane %v1455_v48, 4  ;;  %v1376_v24 = vmul.f32 %v1327_v34, %v2053_v23  ;;  %v1347_v52 = vpop.permute.xlu0 %1346  ;;  %v1451_v37 = vrot.slane %v1450_v3, 2  ;;  %v1516_v14 = vsel %vm886_vm7, %v1419_v4, %v1515_v43 }
 0x409   : > { %v1443_v2 = vadd.f32 %v1442_v22, %v1441_v45  ;;  %v1380_v28 = vmul.f32 %v1347_v52, %v2081_v31  ;;  %v1431_v55 = vadd.f32 %v1430_v60, %v1429_v51  ;;  %v1426_v13 = vadd.f32 %v1425_v61, %v1424_v44 }
 0x40a   : > { %v1457_v25 = vadd.f32 %v1456_v50, %v1455_v48  ;;  %v1434_v46 = vsel %vm334_vm2, %v1376_v24, 0.0  ;;  %v1452_v17 = vadd.f32 %v1451_v37, %v1450_v3 }
 0x40b   : > { %v1444_v57 = vrot.slane %v1443_v2, 2  ;;  %v1435_v59 = vrot.slane %v1434_v46, 4  ;;  %v1462_v58 = vsel %vm334_vm2, %v1380_v28, 0.0  ;;  %v1362_v12 = vpop.permute.xlu1 %1361  ;;  %v1432_v49 = vrot.slane %v1431_v55, 1 }
 0x40c   : > { %v1458_v15 = vrot.slane %v1457_v25, 2  ;;  %v1463_v23 = vrot.slane %v1462_v58, 4  ;;  %v1383_v26 = vmul.f32 %v1362_v12, %v2099_v36  ;;  %v1352_v29 = vpop.permute.xlu0 %1351  ;;  %v1453_v30 = vrot.slane %v1452_v17, 1 }
 0x40d   : > { %v1445_v31 = vadd.f32 %v1444_v57, %v1443_v2  ;;  %v1436_v0 = vadd.f32 %v1435_v59, %v1434_v46  ;;  %v1381_v1 = vmul.f32 %v1352_v29, %v2085_v32  ;;  %v1433_v33 = vadd.f32 %v1432_v49, %v1431_v55 }
 0x40e   : > { %v1464_v56 = vadd.f32 %v1463_v23, %v1462_v58  ;;  %v1483_v5 = vsel %vm334_vm2, %v1383_v26, 0.0  ;;  %v1459_v18 = vadd.f32 %v1458_v15, %v1457_v25  ;;  %v1517_v45 = vsel %vm888_vm8, %v1426_v13, %v1516_v14 }
 0x40f   : > { %v1437_v16 = vrot.slane %v1436_v0, 2  ;;  %v1484_v62 = vrot.slane %v1483_v5, 4  ;;  %v1469_v42 = vsel %vm334_vm2, %v1381_v1, 0.0  ;;  %v1446_v19 = vrot.slane %v1445_v31, 1 }
 0x410   : > { %v1465_v36 = vrot.slane %v1464_v56, 2  ;;  %v1470_v40 = vrot.slane %v1469_v42, 4  ;;  %v1357_v39 = vpop.permute.xlu0 %1356  ;;  %v1460_v54 = vrot.slane %v1459_v18, 1  ;;  %v1518_v44 = vsel %vm890_vm9, %v1433_v33, %v1517_v45 }
 0x411   : > { %v1438_v9 = vadd.f32 %v1437_v16, %v1436_v0  ;;  %v1485_v41 = vadd.f32 %v1484_v62, %v1483_v5  ;;  %v1382_v32 = vmul.f32 %v1357_v39, %v2095_v35  ;;  %v1447_v60 = vadd.f32 %v1446_v19, %v1445_v31 }
 0x412   : > { %v1466_v63 = vadd.f32 %v1465_v36, %v1464_v56  ;;  %v1471_v47 = vadd.f32 %v1470_v40, %v1469_v42  ;;  %v1454_v52 = vadd.f32 %v1453_v30, %v1452_v17  ;;  %v1461_v28 = vadd.f32 %v1460_v54, %v1459_v18 }
 0x413   : > { %v1439_v10 = vrot.slane %v1438_v9, 1  ;;  %v1476_v20 = vsel %vm334_vm2, %v1382_v32, 0.0  ;;  %v1486_v3 = vrot.slane %v1485_v41, 2 }
 0x414   : > { %v1472_v51 = vrot.slane %v1471_v47, 2  ;;  %v1477_v21 = vrot.slane %v1476_v20, 4  ;;  %v1367_v27 = vpop.permute.xlu0 %1366  ;;  %v1467_v48 = vrot.slane %v1466_v63, 1  ;;  %v1520_v55 = vsel %vm880_vm4, %v1454_v52, %v1447_v60 }
 0x415   : > { %v1384_v35 = vmul.f32 %v1367_v27, %v2108_v38  ;;  %v1440_v22 = vadd.f32 %v1439_v10, %v1438_v9  ;;  %v1487_v8 = vadd.f32 %v1486_v3, %v1485_v41  ;;  %v1521_v58 = vsel %vm882_vm5, %v1461_v28, %v1520_v55 }
 0x416   : > { %v1473_v34 = vadd.f32 %v1472_v51, %v1471_v47  ;;  %v1478_v6 = vadd.f32 %v1477_v21, %v1476_v20  ;;  %v1468_v38 = vadd.f32 %v1467_v48, %v1466_v63 }
 0x417   : > { %v1490_v50 = vsel %vm334_vm2, %v1384_v35, 0.0  ;;  %v1519_v24 = vsel %vm892_vm10, %v1440_v22, %v1518_v44  ;;  %v1488_v12 = vrot.slane %v1487_v8, 1 }
 0x418   : > { %v1474_v53 = vrot.slane %v1473_v34, 1  ;;  %v1479_v11 = vrot.slane %v1478_v6, 2  ;;  %v1491_v2 = vrot.slane %v1490_v50, 4  ;;  %1529 = vxpose.xlu1.b32.start [1/2] (short) (narrow) %v1519_v24, 32  ;;  %v1522_v61 = vsel %vm884_vm6, %v1468_v38, %v1521_v58 }
 0x419   : > { %v1489_v31 = vadd.f32 %v1488_v12, %v1487_v8 }
 0x41a   : > { %v1480_v25 = vadd.f32 %v1479_v11, %v1478_v6  ;;  %v1492_v46 = vadd.f32 %v1491_v2, %v1490_v50  ;;  %v1475_v37 = vadd.f32 %v1474_v53, %v1473_v34 }
 0x41c   : > { %v1481_v57 = vrot.slane %v1480_v25, 1  ;;  %v1493_v59 = vrot.slane %v1492_v46, 2  ;;  %v1523_v26 = vsel %vm886_vm7, %v1475_v37, %v1522_v61 }
 0x41e   : > { %v1482_v15 = vadd.f32 %v1481_v57, %v1480_v25  ;;  %v1494_v23 = vadd.f32 %v1493_v59, %v1492_v46 }
 0x420   : > { %v1495_v29 = vrot.slane %v1494_v23, 1  ;;  %v1524_v7 = vsel %vm888_vm8, %v1482_v15, %v1523_v26 }
 0x421   : > { %v1525_v1 = vsel %vm890_vm9, %v1489_v31, %v1524_v7 }
 0x422   : > { %v1496_v0 = vadd.f32 %v1495_v29, %v1494_v23 }
 0x424   : > { %v1526_v4 = vsel %vm892_vm10, %v1496_v0, %v1525_v1 }
 0x425   : > { %1530 = vxpose.xlu1.b32.end [2/2] (short) (narrow) %v1526_v4, 32 }
 0x4a1   : > { %v1545_v49 = vpop.trf.xlu1 }
 0x4a2   : > { %1562 = vst.msk [vmem:[%s296_s23] sm:$0xff] %vm1561_vm11, %v1545_v49 }
 0x4a5   : > { %v1546_v56 = vpop.trf.xlu1 }
 0x4a6   : > { %1563 = vst.msk [vmem:[%s296_s23 + $0x8] sm:$0xff] %vm1561_vm11, %v1546_v56 }
 0x4a9   : > { %v1547_v5 = vpop.trf.xlu1 }
 0x4aa   : > { %1564 = vst.msk [vmem:[%s296_s23 + $0x10] sm:$0xff] %vm1561_vm11, %v1547_v5 }
 0x4ad   : > { %v1548_v17 = vpop.trf.xlu1 }
 0x4ae   : > { %1565 = vst.msk [vmem:[%s296_s23 + $0x18] sm:$0xff] %vm1561_vm11, %v1548_v17 }
 0x4af PF: > { %s15_s20 = sadd.s32 1, %s1922_s20   ;;  %s2464_s18 = smov %s1918_s19 }
 0x4b0   : > { %p12_p5 = scmp.ge.s32.totalorder %s15_s20, 4   ;;  %s2465_s19 = smov %s2467_s21 }
 0x4b2   :  { %14 = sbr.rel (!%p12_p5) target bundleno = 2 (0x2), region = 73 }

</bundles_post_ra>
